<compile_context>
chip_gen: v7x
topology: tpu7x:2x2x1
jax: 0.10.0
libtpu: 0.0.40
codegen_flags: <defaults>
</compile_context>

<pallas_src>
import functools

import jax
import jax.numpy as jnp
from jax.experimental import pallas as pl
from jax.experimental.pallas import tpu as pltpu

_HAS_BUFFERED = hasattr(pl, "Buffered")


# --------------------------- small helpers ----------------------------------

def _round_up(x, m):
    return ((x + m - 1) // m) * m


def _row_align(dtype):
    # bf16 packs 2 rows/sublane, int8/fp8 pack 4: keep row tiles a multiple of
    # the dtype tile height so x/out tiles keep their native layout.
    return max(8, 32 // jnp.dtype(dtype).itemsize)


@functools.lru_cache(maxsize=1)
def _vmem_capacity_bytes():
    try:
        info = pltpu.get_tpu_info()
        for attr in ("vmem_capacity_bytes", "vmem_bytes", "vmem_size_bytes"):
            v = getattr(info, attr, None)
            if v:
                return int(v)
    except Exception:
        pass
    return 64 * 1024 * 1024  # conservative fallback: v7x per-TensorCore VMEM


@functools.lru_cache(maxsize=1)
def _device_kind():
    try:
        return jax.devices()[0].device_kind.lower()
    except Exception:
        return ""


def _pick_tm(M, target, align):
    """Row-tile size: dtype-aligned, never larger than needed and — when the
    row count allows — small enough that grid_m >= 2 so the 'parallel' axis
    can be sharded across both v7x TensorCores."""
    tm = min(target, _round_up(M, align))
    tm = _round_up(tm, align)
    if M > 2 * align and pl.cdiv(M, tm) < 2:
        tm = _round_up(pl.cdiv(M, 2), align)
    return max(tm, align)


def _resident_vmem_bytes(tm, H, I, xb, wb, weight_bufs):
    return (4 * tm * H * xb                             # x + out tiles, 2-deep
            + weight_bufs * (2 * H * I + I + H) * wb    # W1, W2, b1, b2
            + 4 * tm * I * 4)                           # f32 fc1/GELU temps


def _streaming_vmem_bytes(tm, tk, H, xb, wb):
    return (4 * tm * H * xb                             # x + out tiles, 2-deep
            + 2 * (2 * H * tk + tk + H) * wb            # W1/W2/b1 chunks, b2
            + tm * H * 4                                # f32 accumulator
            + 4 * tm * tk * 4)                          # f32 fc1/GELU temps


def _weight_spec(shape, index_map, single_buffer):
    # Buffered(1) halves the resident weight footprint; fall back to a plain
    # (double-buffered) spec if this Pallas version lacks pipeline_mode.
    if single_buffer and _HAS_BUFFERED:
        try:
            return pl.BlockSpec(shape, index_map, pipeline_mode=pl.Buffered(1))
        except TypeError:
            pass
    return pl.BlockSpec(shape, index_map)


# ------------------------------ kernels --------------------------------------

def _gelu_tanh_f32(h):
    # tanh-approx GELU in f32 (tanh goes to the EUP slot).  Cubic factored as
    # h*(1 + 0.044715*h^2) to save a vmul and one (tm, tk) f32 temporary.
    c = jnp.float32(0.7978845608028654)  # sqrt(2/pi)
    return 0.5 * h * (1.0 + jnp.tanh(c * (h * (1.0 + 0.044715 * (h * h)))))


def _resident_kernel(x_ref, w1_ref, b1_ref, w2_ref, b2_ref, o_ref):
    h = jnp.dot(x_ref[...], w1_ref[...], preferred_element_type=jnp.float32)
    h = h + b1_ref[...].astype(jnp.float32)
    g = _gelu_tanh_f32(h)
    out = jnp.dot(g.astype(w2_ref.dtype), w2_ref[...],
                  preferred_element_type=jnp.float32)
    o_ref[...] = (out + b2_ref[...].astype(jnp.float32)).astype(o_ref.dtype)


def _streaming_kernel(x_ref, w1_ref, b1_ref, w2_ref, b2_ref, o_ref, acc_ref):
    k = pl.program_id(1)

    @pl.when(k == 0)
    def _():
        acc_ref[...] = jnp.zeros_like(acc_ref)

    h = jnp.dot(x_ref[...], w1_ref[...], preferred_element_type=jnp.float32)
    h = h + b1_ref[...].astype(jnp.float32)
    g = _gelu_tanh_f32(h)
    acc_ref[...] += jnp.dot(g.astype(w2_ref.dtype), w2_ref[...],
                            preferred_element_type=jnp.float32)

    @pl.when(k == pl.num_programs(1) - 1)
    def _():
        o_ref[...] = (acc_ref[...]
                      + b2_ref[...].astype(jnp.float32)).astype(o_ref.dtype)


# ------------------------------ wrapper ---------------------------------------

@functools.partial(jax.jit, static_argnames=("tm", "tk", "force_streaming"))
def siglip_mlp(x, w1, b1, w2, b2, *, tm=None, tk=None, force_streaming=False):
    """SiglipMLP forward.  x: (B,S,H); w1: (H,I); b1: (I,); w2: (I,H); b2: (H,)."""
    B, S, H = x.shape
    I = w1.shape[1]
    M = B * S

    xb = jnp.dtype(x.dtype).itemsize
    wb = jnp.dtype(w1.dtype).itemsize
    align = _row_align(x.dtype)

    vmem_cap = _vmem_capacity_bytes()
    budget = int(0.8 * vmem_cap)  # headroom for Mosaic internal scratch

    x2d = x.reshape(M, H)

    # ---- plan: weights-resident if W1/W2/b1/b2 fit the VMEM budget ----------
    plan = None
    if not force_streaming:
        cands = (tm,) if tm is not None else (512, 384, 256, 128, 64)
        for tm_cand in cands:
            tm_r = _pick_tm(M, tm_cand, align)
            for weight_bufs in (2, 1):
                if weight_bufs == 1 and not _HAS_BUFFERED:
                    continue
                if _resident_vmem_bytes(tm_r, H, I, xb, wb, weight_bufs) <= budget:
                    plan = (tm_r, weight_bufs == 1)
                    break
            if plan is not None:
                break

    if plan is not None:
        tm_r, single_buf = plan
        grid_m = pl.cdiv(M, tm_r)
        cost = pl.CostEstimate(
            flops=4 * M * H * I,
            transcendentals=M * I,
            bytes_accessed=int(2 * M * H * xb + (2 * H * I + I + H) * wb),
        )
        out2d = pl.pallas_call(
            _resident_kernel,
            out_shape=jax.ShapeDtypeStruct((M, H), x.dtype),
            grid_spec=pltpu.PrefetchScalarGridSpec(
                num_scalar_prefetch=0,
                grid=(grid_m,),
                in_specs=[
                    pl.BlockSpec((tm_r, H), lambda i: (i, 0)),       # x row tile
                    _weight_spec((H, I), lambda i: (0, 0), single_buf),  # W1
                    _weight_spec((1, I), lambda i: (0, 0), single_buf),  # b1
                    _weight_spec((I, H), lambda i: (0, 0), single_buf),  # W2
                    _weight_spec((1, H), lambda i: (0, 0), single_buf),  # b2
                ],
                out_specs=pl.BlockSpec((tm_r, H), lambda i: (i, 0)),
            ),
            compiler_params=pltpu.CompilerParams(
                dimension_semantics=("parallel",),
                vmem_limit_bytes=budget,
            ),
            cost_estimate=cost,
        )(x2d, w1, b1.reshape(1, I), w2, b2.reshape(1, H))
        return out2d.reshape(B, S, H)

    # ---- fallback: stream W1/W2 chunks along a zero-padded intermediate axis --
    tk_s = tk if tk is not None else min(512, _round_up(I, 128))
    I_pad = _round_up(I, tk_s)

    if tm is not None:
        tm_s = _pick_tm(M, tm, align)
    else:
        kind = _device_kind()
        if "v5" in kind:                        # v5e: DMA/MXU balanced at 256
            tm_target = 256
        elif vmem_cap <= 80 * 1024 * 1024:      # v7x: 64 MiB/TC, fast HBM
            tm_target = 512
        else:                                   # v6e and other 128 MiB parts
            tm_target = 1024
        tm_s = _pick_tm(M, tm_target, align)
    while (_streaming_vmem_bytes(tm_s, tk_s, H, xb, wb) > budget
           and tm_s > align):
        tm_s = max(align, _round_up(tm_s // 2, align))

    if I_pad != I:
        # Zero padding is exact: gelu(0) == 0 and the padded W2 rows are zero,
        # so the padded intermediate columns contribute nothing to the output.
        w1 = jnp.pad(w1, ((0, 0), (0, I_pad - I)))
        b1 = jnp.pad(b1, ((0, I_pad - I),))
        w2 = jnp.pad(w2, ((0, I_pad - I), (0, 0)))

    grid_m = pl.cdiv(M, tm_s)
    grid_k = I_pad // tk_s
    cost = pl.CostEstimate(
        flops=4 * M * H * I_pad,
        transcendentals=M * I_pad,
        bytes_accessed=int(2 * M * H * xb
                           + grid_m * (2 * H * I_pad + I_pad + H) * wb),
    )
    out2d = pl.pallas_call(
        _streaming_kernel,
        out_shape=jax.ShapeDtypeStruct((M, H), x.dtype),
        grid_spec=pltpu.PrefetchScalarGridSpec(
            num_scalar_prefetch=0,
            grid=(grid_m, grid_k),
            in_specs=[
                pl.BlockSpec((tm_s, H), lambda i, k: (i, 0)),    # x row tile
                pl.BlockSpec((H, tk_s), lambda i, k: (0, k)),    # W1 chunk
                pl.BlockSpec((1, tk_s), lambda i, k: (0, k)),    # b1 chunk
                pl.BlockSpec((tk_s, H), lambda i, k: (k, 0)),    # W2 chunk
                pl.BlockSpec((1, H), lambda i, k: (0, 0)),       # b2
            ],
            out_specs=pl.BlockSpec((tm_s, H), lambda i, k: (i, 0)),
            scratch_shapes=[pltpu.VMEM((tm_s, H), jnp.float32)],  # fc2 acc
        ),
        compiler_params=pltpu.CompilerParams(
            dimension_semantics=("parallel", "arbitrary"),
            vmem_limit_bytes=budget,
        ),
        cost_estimate=cost,
    )(x2d, w1, b1.reshape(1, I_pad), w2, b2.reshape(1, H))
    return out2d.reshape(B, S, H)


# -------------------------- pure-JAX reference --------------------------------

def _gelu_tanh_ref(x):
    c = jnp.float32(0.7978845608028654)
    return 0.5 * x * (1.0 + jnp.tanh(c * (x + 0.044715 * x**3)))


def _mlp_ref(x, w1, b1, w2, b2):
    h = jnp.einsum("bsh,hi->bsi", x, w1) + b1
    g = _gelu_tanh_ref(h)
    return jnp.einsum("bsi,ih->bsh", g, w2) + b2


if __name__ == "__main__":
    # Small SiglipVisionConfig-style dims.
    batch, seq = 2, 8
    hidden_size = 32
    intermediate_size = 128

    key = jax.random.PRNGKey(0)
    kx, k1, k2, k3, k4 = jax.random.split(key, 5)

    x = jax.random.normal(kx, (batch, seq, hidden_size), dtype=jnp.float32)

    # Parameters stored as (in, out) for the kernel (pre-transposed nn.Linear).
    w1 = jax.random.normal(k1, (hidden_size, intermediate_size),
                           dtype=jnp.float32) * 0.02
    b1 = jax.random.normal(k2, (intermediate_size,), dtype=jnp.float32) * 0.02
    w2 = jax.random.normal(k3, (intermediate_size, hidden_size),
                           dtype=jnp.float32) * 0.02
    b2 = jax.random.normal(k4, (hidden_size,), dtype=jnp.float32) * 0.02

    ref = _mlp_ref(x, w1, b1, w2, b2)

    # --- f32, weights-resident path ---
    out = jax.block_until_ready(siglip_mlp(x, w1, b1, w2, b2))
    assert out.shape == (batch, seq, hidden_size)
    assert jnp.allclose(out, ref, atol=2e-5, rtol=2e-5), "f32 mismatch vs reference"

    # --- bf16 (native-dtype MXU path, f32 accumulation) ---
    out_bf16 = jax.block_until_ready(
        siglip_mlp(x.astype(jnp.bfloat16),
                   w1.astype(jnp.bfloat16), b1.astype(jnp.bfloat16),
                   w2.astype(jnp.bfloat16), b2.astype(jnp.bfloat16)))
    assert jnp.allclose(out_bf16.astype(jnp.float32), ref,
                        atol=5e-2, rtol=5e-2), "bf16 mismatch vs reference"

    # --- streaming path, forced, with I not a multiple of the chunk size:
    #     exercises the zero-padded intermediate axis + k-accumulation.
    i_odd = 200
    kw5, kw6, kw7 = jax.random.split(k4, 3)
    w1o = jax.random.normal(kw5, (hidden_size, i_odd), dtype=jnp.float32) * 0.02
    b1o = jax.random.normal(kw6, (i_odd,), dtype=jnp.float32) * 0.02
    w2o = jax.random.normal(kw7, (i_odd, hidden_size), dtype=jnp.float32) * 0.02
    ref_o = _mlp_ref(x, w1o, b1o, w2o, b2)
    out_o = jax.block_until_ready(
        siglip_mlp(x, w1o, b1o, w2o, b2, tk=128, force_streaming=True))
    assert jnp.allclose(out_o, ref_o, atol=2e-5, rtol=2e-5), \
        "streaming (padded-I) mismatch vs reference"

    print("KERNEL_OK")
</pallas_src>

<mosaic_0001>
module attributes {stable_mosaic.version = 11 : i64} {
  func.func @_resident_kernel(%arg0: i32, %arg1: memref<16x32xf32, #tpu.memory_space<vmem>>, %arg2: memref<32x128xf32, #tpu.memory_space<vmem>>, %arg3: memref<1x128xf32, #tpu.memory_space<vmem>>, %arg4: memref<128x32xf32, #tpu.memory_space<vmem>>, %arg5: memref<1x32xf32, #tpu.memory_space<vmem>>, %arg6: memref<16x32xf32, #tpu.memory_space<vmem>>) attributes {dimension_semantics = [#tpu.dimension_semantics<parallel>], iteration_bounds = array<i64: 1>, scalar_prefetch = 0 : i64, scratch_operands = 0 : i64, tpu.core_type = #tpu.core_type<tc>, window_params = [{transform_indices = @transform_0, window_bounds = array<i64: 16, 32>}, {pipeline_mode = #tpu.pipeline_mode<synchronous>, transform_indices = @transform_1, window_bounds = array<i64: 32, 128>}, {pipeline_mode = #tpu.pipeline_mode<synchronous>, transform_indices = @transform_2, window_bounds = array<i64: 1, 128>}, {pipeline_mode = #tpu.pipeline_mode<synchronous>, transform_indices = @transform_3, window_bounds = array<i64: 128, 32>}, {pipeline_mode = #tpu.pipeline_mode<synchronous>, transform_indices = @transform_4, window_bounds = array<i64: 1, 32>}, {transform_indices = @transform_5, window_bounds = array<i64: 16, 32>}]} {
    %c0 = arith.constant 0 : index
    %c0_0 = arith.constant 0 : index
    %0 = vector.load %arg1[%c0, %c0_0] : memref<16x32xf32, #tpu.memory_space<vmem>>, vector<16x32xf32>
    %c0_1 = arith.constant 0 : index
    %c0_2 = arith.constant 0 : index
    %1 = vector.load %arg2[%c0_1, %c0_2] : memref<32x128xf32, #tpu.memory_space<vmem>>, vector<32x128xf32>
    %cst = arith.constant dense<0.000000e+00> : vector<16x128xf32>
    %2 = tpu.matmul %0, %1, %cst {dimension_numbers = #tpu.dot_dimension_numbers<[1], [0], [0], [1], [0, 0, 1, 1], [], []>} : vector<16x32xf32>, vector<32x128xf32>, vector<16x128xf32> -> vector<16x128xf32>
    %c0_3 = arith.constant 0 : index
    %c0_4 = arith.constant 0 : index
    %3 = vector.load %arg3[%c0_3, %c0_4] : memref<1x128xf32, #tpu.memory_space<vmem>>, vector<1x128xf32>
    %4 = vector.broadcast %3 : vector<1x128xf32> to vector<16x128xf32>
    %5 = arith.addf %2, %4 : vector<16x128xf32>
    %cst_5 = arith.constant 5.000000e-01 : f32
    %6 = vector.broadcast %cst_5 : f32 to vector<16x128xf32>
    %7 = arith.mulf %6, %5 : vector<16x128xf32>
    %8 = arith.mulf %5, %5 : vector<16x128xf32>
    %cst_6 = arith.constant 4.471500e-02 : f32
    %9 = vector.broadcast %cst_6 : f32 to vector<16x128xf32>
    %10 = arith.mulf %9, %8 : vector<16x128xf32>
    %cst_7 = arith.constant 1.000000e+00 : f32
    %11 = vector.broadcast %cst_7 : f32 to vector<16x128xf32>
    %12 = arith.addf %11, %10 : vector<16x128xf32>
    %13 = arith.mulf %5, %12 : vector<16x128xf32>
    %cst_8 = arith.constant 0.797884583 : f32
    %14 = vector.broadcast %cst_8 : f32 to vector<16x128xf32>
    %15 = arith.mulf %14, %13 : vector<16x128xf32>
    %16 = math.tanh %15 : vector<16x128xf32>
    %cst_9 = arith.constant 1.000000e+00 : f32
    %17 = vector.broadcast %cst_9 : f32 to vector<16x128xf32>
    %18 = arith.addf %17, %16 : vector<16x128xf32>
    %19 = arith.mulf %7, %18 : vector<16x128xf32>
    %c0_10 = arith.constant 0 : index
    %c0_11 = arith.constant 0 : index
    %20 = vector.load %arg4[%c0_10, %c0_11] : memref<128x32xf32, #tpu.memory_space<vmem>>, vector<128x32xf32>
    %cst_12 = arith.constant dense<0.000000e+00> : vector<16x32xf32>
    %21 = tpu.matmul %19, %20, %cst_12 {dimension_numbers = #tpu.dot_dimension_numbers<[1], [0], [0], [1], [0, 0, 1, 1], [], []>} : vector<16x128xf32>, vector<128x32xf32>, vector<16x32xf32> -> vector<16x32xf32>
    %c0_13 = arith.constant 0 : index
    %c0_14 = arith.constant 0 : index
    %22 = vector.load %arg5[%c0_13, %c0_14] : memref<1x32xf32, #tpu.memory_space<vmem>>, vector<1x32xf32>
    %23 = vector.broadcast %22 : vector<1x32xf32> to vector<16x32xf32>
    %24 = arith.addf %21, %23 : vector<16x32xf32>
    %c0_15 = arith.constant 0 : index
    %c0_16 = arith.constant 0 : index
    %25 = vector.load %arg6[%c0_15, %c0_16] : memref<16x32xf32, #tpu.memory_space<vmem>>, vector<16x32xf32>
    tpu.vector_store %arg6[%c0_15, %c0_16], %24 {strides = array<i32>} : memref<16x32xf32, #tpu.memory_space<vmem>>, vector<16x32xf32>,
    return
  }
  func.func @transform_0(%arg0: i32) -> (i32, i32) {
    %c0_i32 = arith.constant 0 : i32
    %c0_i32_0 = arith.constant 0 : i32
    return %arg0, %c0_i32 : i32, i32
  }
  func.func @transform_1(%arg0: i32) -> (i32, i32) {
    %c0_i32 = arith.constant 0 : i32
    %c0_i32_0 = arith.constant 0 : i32
    %c0_i32_1 = arith.constant 0 : i32
    return %c0_i32, %c0_i32_0 : i32, i32
  }
  func.func @transform_2(%arg0: i32) -> (i32, i32) {
    %c0_i32 = arith.constant 0 : i32
    %c0_i32_0 = arith.constant 0 : i32
    %c0_i32_1 = arith.constant 0 : i32
    return %c0_i32, %c0_i32_0 : i32, i32
  }
  func.func @transform_3(%arg0: i32) -> (i32, i32) {
    %c0_i32 = arith.constant 0 : i32
    %c0_i32_0 = arith.constant 0 : i32
    %c0_i32_1 = arith.constant 0 : i32
    return %c0_i32, %c0_i32_0 : i32, i32
  }
  func.func @transform_4(%arg0: i32) -> (i32, i32) {
    %c0_i32 = arith.constant 0 : i32
    %c0_i32_0 = arith.constant 0 : i32
    %c0_i32_1 = arith.constant 0 : i32
    return %c0_i32, %c0_i32_0 : i32, i32
  }
  func.func @transform_5(%arg0: i32) -> (i32, i32) {
    %c0_i32 = arith.constant 0 : i32
    %c0_i32_0 = arith.constant 0 : i32
    return %arg0, %c0_i32 : i32, i32
  }
}

</mosaic_0001>

<bundles_post_ra>
// kernel: siglip_mlp.1
= control target key start
LH: loop header
LB: loop body
LE: loop exit
PB: predicated region body
PF: predicated region fallthrough
CT: control target
= control target key end

     0   :  { %vm34_vm0 = vcmask 261120   ;;  %s516_s0 = inlined_call_operand.vmem [shape: f32[16,32], index: 0, kind: input, shape index: {}]   ;;  %s517_s1 = inlined_call_operand.vmem [shape: f32[32,128], index: 1, kind: input, shape index: {}]   ;;  %s518_s2 = inlined_call_operand.vmem [shape: f32[1,128], index: 2, kind: input, shape index: {}]   ;;  %s519_s3 = inlined_call_operand.vmem [shape: f32[128,32], index: 3, kind: input, shape index: {}]   ;;  %s520_s4 = inlined_call_operand.vmem [shape: f32[1,32], index: 4, kind: input, shape index: {}]   ;;  %s521_s5 = inlined_call_operand.hbm [shape: f32[16,32], index: 5, kind: output, shape index: {}]  }
   0x1   :  { %v23_v0 = vld [vmem:[%s517_s1] sm:$0xff]  ;;  %v24_v1 = vld [vmem:[%s517_s1 + $0x8] sm:$0xff]  ;;  %v25_v2 = vld [vmem:[%s517_s1 + $0x10] sm:$0xff] }
   0x2   :  { %v324_v3 = vpack.c.bf16 %v24_v1, %v23_v0  ;;  %v26_v4 = vld [vmem:[%s517_s1 + $0x18] sm:$0xff]  ;;  %v21_v5 = vld [vmem:[%s516_s0] sm:$0xff]  ;;  %v135_v8 = vld [vmem:[%s519_s3 + $0x8] sm:$0xff] }
   0x3   :  { %v328_v6 = vpack.c.bf16 %v26_v4, %v25_v2  ;;  %286 = vmatprep.mubr.msk.f32.mxu0 %vm34_vm0, %v21_v5  ;;  %v134_v7 = vld [vmem:[%s519_s3] sm:$0xff] }
   0x4   :  { %10 = vsyncpa [#allocation3], 0  ;;  %325 = vmatprep.subr.bf16.mxu0 %v324_v3  ;;  %v332_v9 = vpack.c.bf16 %v135_v8, %v134_v7  ;;  %v22_v10 = vld [vmem:[%s516_s0 + $0x8] sm:$0xff]  ;;  %v136_v11 = vld [vmem:[%s519_s3 + $0x10] sm:$0xff]  ;;  %s395_s11 = smov [#allocation2]  }
   0x5   :  { %327 = vmatpush3.bf16.msra.mxu0 %v324_v3  ;;  %v137_v12 = vld [vmem:[%s519_s3 + $0x18] sm:$0xff]  ;;  %v138_v14 = vld [vmem:[%s519_s3 + $0x20] sm:$0xff]  ;;  %v139_v15 = vld [vmem:[%s519_s3 + $0x28] sm:$0xff]  ;;  %s239_s12 = sshll.u32 %s395_s11, 4  ;;  %s240_s12 = int_to_ptr.vmem [resolvable:$true] %s239_s12 }
   0x6   :  { %329 = vmatprep.subr.bf16.mxu0 %v328_v6  ;;  %333 = vmatprep.subr.bf16.mxu1 %v332_v9  ;;  %v336_v13 = vpack.c.bf16 %v137_v12, %v136_v11  ;;  %v340_v16 = vpack.c.bf16 %v139_v15, %v138_v14  ;;  %v140_v17 = vld [vmem:[%s519_s3 + $0x30] sm:$0xff]  ;;  %v141_v18 = vld [vmem:[%s519_s3 + $0x38] sm:$0xff]  ;;  %v142_v20 = vld [vmem:[%s519_s3 + $0x40] sm:$0xff]  ;;  %s371_s13 = scalar_lea.vmem %s240_s12, 256  ;;  %p376_p1 = scmp.lt.s32.totalorder %s240_s12, %s240_s12 }
   0x7   :  { %335 = vmatpush3.bf16.msra.mxu1 %v332_v9  ;;  %v344_v19 = vpack.c.bf16 %v141_v18, %v140_v17  ;;  %v143_v21 = vld [vmem:[%s519_s3 + $0x48] sm:$0xff]  ;;  %v144_v23 = vld [vmem:[%s519_s3 + $0x50] sm:$0xff]  ;;  %v145_v24 = vld [vmem:[%s519_s3 + $0x58] sm:$0xff]  ;;  %p372_p0 = scmp.ne.s32.totalorder %s240_s12, %s371_s13  ;;  %p377_p2 = scmp.lt.s32.totalorder %s371_s13, %s371_s13 }
   0x8   :  { %337 = vmatprep.subr.bf16.mxu1 %v336_v13  ;;  %v348_v22 = vpack.c.bf16 %v143_v21, %v142_v20  ;;  %v146_v25 = vld [vmem:[%s519_s3 + $0x60] sm:$0xff]  ;;  %v352_v26 = vpack.c.bf16 %v145_v24, %v144_v23  ;;  %v147_v27 = vld [vmem:[%s519_s3 + $0x68] sm:$0xff]  ;;  %v148_v29 = vld [vmem:[%s519_s3 + $0x70] sm:$0xff] }
   0x9   :  { %331 = vmatpush3.bf16.msra.mxu0 %v328_v6  ;;  %v356_v28 = vpack.c.bf16 %v147_v27, %v146_v25  ;;  %v149_v30 = vld [vmem:[%s519_s3 + $0x78] sm:$0xff]  ;;  %v250_v32 = vld [vmem:[%s518_s2] ss:$0 sm:$0xff]  ;;  %p378_p3 = por %p377_p2, %p376_p1 }
   0xa   :  { %v360_v31 = vpack.c.bf16 %v149_v30, %v148_v29  ;;  %v253_v55 = vld [vmem:[%s520_s4] ss:$0 sm:$0xff] }
   0xb   :  { %339 = vmatpush3.bf16.msra.mxu1 %v336_v13  ;;  %p379_p4 = pnand %p378_p3, %p372_p0 }
   0xc   :  { %287 = vmatmul.mubr.msk.f32.vlgmr.msra.gmra.mrb[0].mxu0 %vm34_vm0, %v22_v10  ;;  %341 = vmatprep.subr.bf16.mxu1 %v340_v16 }
   0xf   :  { %343 = vmatpush3.bf16.msra.mxu1 %v340_v16 }
  0x10   :  { %345 = vmatprep.subr.bf16.mxu1 %v344_v19 }
  0x13   :  { %347 = vmatpush3.bf16.msra.mxu1 %v344_v19 }
  0x14   :  { %349 = vmatprep.subr.bf16.mxu1 %v348_v22 }
  0x17   :  { %351 = vmatpush3.bf16.msra.mxu1 %v348_v22 }
  0x18   :  { %353 = vmatprep.subr.bf16.mxu1 %v352_v26 }
  0x1b   :  { %355 = vmatpush3.bf16.msra.mxu1 %v352_v26 }
  0x1c   :  { %357 = vmatprep.subr.bf16.mxu1 %v356_v28 }
  0x1f   :  { %359 = vmatpush3.bf16.msra.mxu1 %v356_v28 }
  0x20   :  { %361 = vmatprep.subr.bf16.mxu1 %v360_v31 }
  0x23   :  { %363 = vmatpush3.bf16.msra.mxu1 %v360_v31 }
  0xdf   :  { %v288_v33 = vpop.f32.mrb[0].mxu0 }
  0xe0   :  { %v113_v34 = vadd.f32 %v288_v33, %v250_v32  ;;  %v107_v35 = vpop.f32.mrb[1].mxu0 }
  0xe1   :  { %v108_v36 = vadd.f32 %v250_v32, %v107_v35 }
  0xe2   :  { %v119_v37 = vmul.f32 %v113_v34, %v113_v34  ;;  %v117_v52 = vmul.f32 0.5, %v113_v34 }
  0xe3   :  { %v118_v38 = vmul.f32 %v108_v36, %v108_v36  ;;  %v116_v50 = vmul.f32 0.5, %v108_v36 }
  0xe4   :  { %v121_v39 = vmul.f32 0.044715, %v119_v37 }
  0xe5   :  { %v120_v40 = vmul.f32 0.044715, %v118_v38 }
  0xe6   :  { %v123_v41 = vadd.f32 1.0, %v121_v39 }
  0xe7   :  { %v122_v42 = vadd.f32 1.0, %v120_v40 }
  0xe8   :  { %v125_v43 = vmul.f32 %v123_v41, %v113_v34 }
  0xe9   :  { %v124_v44 = vmul.f32 %v122_v42, %v108_v36 }
  0xea   :  { %v127_v45 = vmul.f32 0.7978846, %v125_v43 }
  0xeb   :  { %v126_v46 = vmul.f32 0.7978846, %v124_v44 }
  0xec   :  { %367 = vtanh.f32 %v127_v45 }
  0xed   :  { %369 = vtanh.f32 %v126_v46 }
  0xf6   :  { %v368_v47 = vpop.eup %367 }
  0xf7   :  { %v370_v48 = vpop.eup %369  ;;  %v131_v49 = vadd.f32 1.0, %v368_v47 }
  0xf8   :  { %v130_v51 = vadd.f32 1.0, %v370_v48 }
  0xf9   :  { %v133_v54 = vmul.f32 %v131_v49, %v117_v52 }
  0xfa   :  { %v132_v53 = vmul.f32 %v130_v51, %v116_v50 }
  0xfc   :  { %321 = vmatprep.mubr.f32.mxu1 %v132_v53 }
  0xfd   :  { %322 = vmatmul.mubr.f32.vlgmr.msra.gmra.mrb[0].mxu1 %v133_v54 }
 0x1d0   :  { %v323_v56 = vpop.f32.mrb[0].mxu1 }
 0x1d1   :  { %v229_v57 = vadd.f32 %v323_v56, %v253_v55  ;;  %v223_v58 = vpop.f32.mrb[1].mxu1 }
 0x1d2   :  { %v224_v59 = vadd.f32 %v253_v55, %v223_v58 }
 0x1d3   :  { %233 = vst.msk [vmem:[#allocation2 + $0x8] sm:$0xff] %vm34_vm0, %v229_v57 }
 0x1d4   :  { %232 = vst.msk [vmem:[#allocation2] sm:$0xff] %vm34_vm0, %v224_v59 }
 0x1d5   :  { %382 = shalt.err (!%p379_p4)
}
 0x1d6   :  { %s383_s15 = scalar_lea.hbm %s521_s5, 256 }
 0x1d7   :  { %p384_p5 = scmp.ne.s32.totalorder %s521_s5, %s383_s15  ;;  %p387_p6 = scmp.lt.u32.totalorder %s383_s15, %s521_s5 }
 0x1d9   :  { %p389_p7 = pnand %p387_p6, %p384_p5 }
 0x1db   :  { %392 = shalt.err (!%p389_p7)
}
 0x1dc   :  { %s396_s19 = smov 128   ;;  %s397_s20 = smov 8  }
 0x1dd   :  { %245 = dma.vmem_to_hbm [thread:$0]  %s240_s12, 256, %s521_s5, [#allocation3], %s396_s19, %s396_s19, %s397_s20  }
 0x1de   :  { %393 = dma.done.wait [#allocation3], 256  }
 0x1df   :  { %394 = vsyncadd [#allocation3], 4294967040 }
 0x1e0   :  { %249 = vsyncpa [#allocation3], 1 }

</bundles_post_ra>
